<compile_context>
chip_gen: v7x
topology: tpu7x:2x2x1
jax: 0.10.0
libtpu: 0.0.40
codegen_flags: <defaults>
</compile_context>

<pallas_src>
import numpy as np
import jax
import jax.numpy as jnp
from jax.experimental import pallas as pl
from jax.experimental.pallas import tpu as pltpu


# ---------------- deterministic Lenia parameters (module defaults) ----------
R_PARAM = 4                 # kernel radius  -> K = 2R+1 = 9
B_PARAM = [1.0]             # kernel shell heights
KN_PARAM = 1                # kernel core function index (uses kernel_core[kn-1])
GN_PARAM = 1                # growth (field) function index
M_PARAM = 0.15
S_PARAM = 0.015
T_PARAM = 10.0
DT_PARAM = 1.0 / T_PARAM


def compute_kernel_norm_np(R, b, kn):
    """Replicates LeniaStepConv2d.compute_kernel() (torch -> numpy).
    The r*(1-r) == 0 case of the exponential core is guarded explicitly
    (torch yields exp(-inf) == 0) so no RuntimeWarning is emitted before the
    weights are baked into the kernel as constants."""
    size = 2 * R + 1
    xs = np.arange(size)
    xx = np.tile(xs, (size, 1)).astype(np.float32)
    yy = np.tile(xs.reshape(-1, 1), (1, size)).astype(np.float32)
    X = (xx - size // 2) / float(R)
    Y = (yy - size // 2) / float(R)
    D = np.sqrt(X ** 2 + Y ** 2)
    k = len(b)
    kr = k * D
    bs = np.array([float(f) for f in b], dtype=np.float32)
    bidx = np.minimum(np.floor(kr).astype(np.int64), k - 1)
    bvals = bs[bidx]
    r = np.minimum(kr % 1.0, 1.0)

    def core_exp(r):
        den = r * (1.0 - r)
        out = np.zeros_like(r)
        good = den > 0.0
        out[good] = np.exp(4.0 - 1.0 / den[good])
        return out

    kernel_core = {
        0: lambda r: (4.0 * r * (1.0 - r)) ** 4,
        1: core_exp,
        2: lambda r, q=0.25: ((r >= q) & (r <= 1.0 - q)).astype(np.float32),
        3: lambda r, q=0.25: ((r >= q) & (r <= 1.0 - q)).astype(np.float32) + (r < q) * 0.5,
    }
    kfunc = kernel_core[kn - 1]
    kernel = (D < 1.0).astype(np.float32) * kfunc(r) * bvals
    kernel_norm = kernel / kernel.sum()
    return kernel_norm.astype(np.float32)


# ---------------------------- Pallas kernel -------------------------------
def make_lenia_kernel(w2d, R, m, s, dt):
    """Builds a Pallas kernel body with the conv weights baked in as constants."""
    w2d = np.asarray(w2d, dtype=np.float32)
    K = w2d.shape[0]
    assert w2d.shape == (K, K) and K == 2 * R + 1
    w = [[float(v) for v in row] for row in w2d]

    nz_cols = [dj for dj in range(K) if any(w[di][dj] != 0.0 for di in range(K))]
    nz_rows = [di for di in range(K) if any(w[di][dj] != 0.0 for dj in range(K))]
    assert nz_rows and nz_cols, "kernel_norm must have nonzero taps"

    # Lenia kernels are radially symmetric -> mirrored taps share weights.
    # Detect exact symmetry at trace time to halve the multiply count.
    h_sym = bool(np.array_equal(w2d, w2d[:, ::-1]))
    v_sym = bool(np.array_equal(w2d, w2d[::-1, :]))

    neg_inv_2s2 = -1.0 / (2.0 * float(s) * float(s))
    m = float(m)
    dt = float(dt)

    def kernel(x_ref, o_ref):
        # x_ref / o_ref: (nb, H, W) float32 blocks (nb whole images).

        def step_one(x):                      # x: (H, W) -> (H, W)
            H, W = x.shape

            def lroll(v, sh):                 # circular shift along W (lanes, XLU)
                sh = sh % W
                return v if sh == 0 else pltpu.roll(v, sh, 1)

            def vroll(v, sh):                 # circular shift along H (sublanes, XLU)
                sh = sh % H
                return v if sh == 0 else pltpu.roll(v, sh, 0)

            # ---- lane (W) direction: hoist the lane shifts out of the tap loop.
            # base[key] is the (pair-summed, if symmetric) lane-shifted image
            # that kernel row di multiplies by w[di][key].
            base = {}
            if h_sym:
                col_reps = sorted({min(dj, K - 1 - dj) for dj in nz_cols})
                for rep in col_reps:
                    mirror = K - 1 - rep
                    v = lroll(x, R - rep)
                    if mirror != rep and mirror in nz_cols:
                        v = v + lroll(x, R - mirror)
                    base[rep] = v
            else:
                for dj in nz_cols:
                    base[dj] = lroll(x, R - dj)

            def row_terms(di):
                terms, seen = [], set()
                for dj in nz_cols:
                    wv = w[di][dj]
                    if wv == 0.0:             # statically skip zero taps
                        continue
                    key = min(dj, K - 1 - dj) if h_sym else dj
                    if key in seen:
                        continue
                    seen.add(key)
                    terms.append((key, wv))
                return terms

            # ---- per-kernel-row weighted sums; one sublane roll per row.
            if v_sym:
                row_reps = sorted({min(di, K - 1 - di) for di in nz_rows})
            else:
                row_reps = list(nz_rows)

            parts = []                        # independent partial sums of the potential
            for di in row_reps:
                terms = row_terms(di)
                if not terms:
                    continue
                key0, w0 = terms[0]
                rs = base[key0] * w0          # init from first tap (no zeros)
                for key, wv in terms[1:]:
                    rs = rs + base[key] * wv
                parts.append(vroll(rs, R - di))
                if v_sym:
                    mirror = K - 1 - di
                    if mirror != di and mirror in nz_rows:
                        parts.append(vroll(rs, R - mirror))

            # Balanced-tree reduction: short dependency chains, fills VALU slots.
            while len(parts) > 1:
                nxt = [a + b for a, b in zip(parts[0::2], parts[1::2])]
                if len(parts) % 2:
                    nxt.append(parts[-1])
                parts = nxt
            potential = parts[0]

            # growth function (gn == 1) + hard clip (is_soft_clip == False)
            d = potential - m
            field = jnp.exp(d * d * neg_inv_2s2) * 2.0 - 1.0
            return jnp.clip(x + dt * field, 0.0, 1.0)

        for n in range(x_ref.shape[0]):       # static unroll over images in block
            o_ref[n] = step_one(x_ref[n]).astype(o_ref.dtype)

    return kernel


def lenia_step_conv2d(x_nchw, kernel_norm_2d, *, m, s, dt, R):
    """One Lenia step. x_nchw: (N, 1, H, W). Returns the same shape (float32)."""
    N, C, H, W = x_nchw.shape
    assert C == 1, "LeniaStepConv2d uses a single-channel (1,1,K,K) kernel"
    NC = N * C
    x = x_nchw.reshape(NC, H, W).astype(jnp.float32)

    kern = make_lenia_kernel(kernel_norm_2d, R=R, m=m, s=s, dt=dt)

    # Images per grid step: amortize the ~0.35us per-step overhead with the
    # largest block that (a) divides the batch, (b) keeps the in-kernel VMEM
    # footprint modest (~10 image-sized temporaries + double-buffered I/O), and
    # (c) leaves >= 2 grid steps when possible so both v7x TensorCores are used.
    img_bytes = H * W * 4
    block_budget = 1 << 20                    # ~1 MiB of input per block
    nb = 1
    for d in range(1, NC + 1):
        if NC % d != 0:
            continue
        if d * img_bytes > block_budget:
            break
        if NC >= 2 and (NC // d) < 2:
            break
        nb = d
    grid_n = NC // nb
    # TODO(synk): halo-tile H for worlds where a single image exceeds the VMEM budget.

    out = pl.pallas_call(
        kern,
        out_shape=jax.ShapeDtypeStruct((NC, H, W), jnp.float32),
        grid_spec=pltpu.PrefetchScalarGridSpec(
            num_scalar_prefetch=0,
            grid=(grid_n,),
            in_specs=[pl.BlockSpec((nb, H, W), lambda i: (i, 0, 0))],
            out_specs=pl.BlockSpec((nb, H, W), lambda i: (i, 0, 0)),
        ),
        compiler_params=pltpu.CompilerParams(
            dimension_semantics=("parallel",),
            vmem_limit_bytes=32 * 1024 * 1024,
        ),
    )(x)
    return out.reshape(N, C, H, W)


# ------------------------------ reference ---------------------------------
def reference_np(x_nchw, w2d, m, s, dt, R):
    N, C, H, W = x_nchw.shape
    K = w2d.shape[0]
    xp = np.pad(x_nchw.astype(np.float64), ((0, 0), (0, 0), (R, R), (R, R)), mode="wrap")
    pot = np.zeros((N, C, H, W), np.float64)
    for di in range(K):
        for dj in range(K):
            wv = float(w2d[di, dj])
            if wv != 0.0:
                pot += wv * xp[:, :, di:di + H, dj:dj + W]
    field = np.exp(-(pot - m) ** 2 / (2.0 * s * s)) * 2.0 - 1.0
    return np.clip(x_nchw.astype(np.float64) + dt * field, 0.0, 1.0)


if __name__ == "__main__":
    key = jax.random.PRNGKey(0)
    # Small but lane-dense shapes (W multiple of 128); single channel as in the module.
    N, C, H, W = 2, 1, 64, 128
    x = jax.random.uniform(key, (N, C, H, W), dtype=jnp.float32)

    kernel_norm = compute_kernel_norm_np(R_PARAM, B_PARAM, KN_PARAM)

    out = lenia_step_conv2d(
        x, kernel_norm, m=M_PARAM, s=S_PARAM, dt=DT_PARAM, R=R_PARAM
    )
    out = jax.block_until_ready(out)

    ref = reference_np(np.asarray(x), kernel_norm, M_PARAM, S_PARAM, DT_PARAM, R_PARAM)
    np.testing.assert_allclose(np.asarray(out), ref, atol=1e-4, rtol=1e-4)

    print("KERNEL_OK")
</pallas_src>

<mosaic_0001>
module attributes {stable_mosaic.version = 11 : i64} {
  func.func @kernel(%arg0: i32, %arg1: memref<1x64x128xf32, #tpu.memory_space<vmem>>, %arg2: memref<1x64x128xf32, #tpu.memory_space<vmem>>) attributes {dimension_semantics = [#tpu.dimension_semantics<parallel>], iteration_bounds = array<i64: 2>, scalar_prefetch = 0 : i64, scratch_operands = 0 : i64, tpu.core_type = #tpu.core_type<tc>, window_params = [{transform_indices = @transform_0, window_bounds = array<i64: 1, 64, 128>}, {transform_indices = @transform_1, window_bounds = array<i64: 1, 64, 128>}]} {
    %c0 = arith.constant 0 : index
    %c0_0 = arith.constant 0 : index
    %c0_1 = arith.constant 0 : index
    %0 = vector.load %arg1[%c0, %c0_0, %c0_1] : memref<1x64x128xf32, #tpu.memory_space<vmem>>, vector<1x64x128xf32>
    %1 = vector.shape_cast %0 : vector<1x64x128xf32> to vector<64x128xf32>
    %c3_i32 = arith.constant 3 : i32
    %2 = tpu.dynamic_rotate %1 by %c3_i32 dim 1 : vector<64x128xf32>, i32 -> vector<64x128xf32>
    %c125_i32 = arith.constant 125 : i32
    %3 = tpu.dynamic_rotate %1 by %c125_i32 dim 1 : vector<64x128xf32>, i32 -> vector<64x128xf32>
    %4 = arith.addf %2, %3 : vector<64x128xf32>
    %c2_i32 = arith.constant 2 : i32
    %5 = tpu.dynamic_rotate %1 by %c2_i32 dim 1 : vector<64x128xf32>, i32 -> vector<64x128xf32>
    %c126_i32 = arith.constant 126 : i32
    %6 = tpu.dynamic_rotate %1 by %c126_i32 dim 1 : vector<64x128xf32>, i32 -> vector<64x128xf32>
    %7 = arith.addf %5, %6 : vector<64x128xf32>
    %c1_i32 = arith.constant 1 : i32
    %8 = tpu.dynamic_rotate %1 by %c1_i32 dim 1 : vector<64x128xf32>, i32 -> vector<64x128xf32>
    %c127_i32 = arith.constant 127 : i32
    %9 = tpu.dynamic_rotate %1 by %c127_i32 dim 1 : vector<64x128xf32>, i32 -> vector<64x128xf32>
    %10 = arith.addf %8, %9 : vector<64x128xf32>
    %cst = arith.constant 7.81870622E-4 : f32
    %11 = vector.broadcast %cst : f32 to vector<64x128xf32>
    %12 = arith.mulf %7, %11 : vector<64x128xf32>
    %cst_2 = arith.constant 0.00941209216 : f32
    %13 = vector.broadcast %cst_2 : f32 to vector<64x128xf32>
    %14 = arith.mulf %10, %13 : vector<64x128xf32>
    %15 = arith.addf %12, %14 : vector<64x128xf32>
    %cst_3 = arith.constant 0.0154799959 : f32
    %16 = vector.broadcast %cst_3 : f32 to vector<64x128xf32>
    %17 = arith.mulf %1, %16 : vector<64x128xf32>
    %18 = arith.addf %15, %17 : vector<64x128xf32>
    %c3_i32_4 = arith.constant 3 : i32
    %19 = tpu.dynamic_rotate %18 by %c3_i32_4 dim 0 : vector<64x128xf32>, i32 -> vector<64x128xf32>
    %c61_i32 = arith.constant 61 : i32
    %20 = tpu.dynamic_rotate %18 by %c61_i32 dim 0 : vector<64x128xf32>, i32 -> vector<64x128xf32>
    %cst_5 = arith.constant 7.81870622E-4 : f32
    %21 = vector.broadcast %cst_5 : f32 to vector<64x128xf32>
    %22 = arith.mulf %4, %21 : vector<64x128xf32>
    %cst_6 = arith.constant 0.0230432134 : f32
    %23 = vector.broadcast %cst_6 : f32 to vector<64x128xf32>
    %24 = arith.mulf %7, %23 : vector<64x128xf32>
    %25 = arith.addf %22, %24 : vector<64x128xf32>
    %cst_7 = arith.constant 0.0462544113 : f32
    %26 = vector.broadcast %cst_7 : f32 to vector<64x128xf32>
    %27 = arith.mulf %10, %26 : vector<64x128xf32>
    %28 = arith.addf %25, %27 : vector<64x128xf32>
    %cst_8 = arith.constant 0.0489244312 : f32
    %29 = vector.broadcast %cst_8 : f32 to vector<64x128xf32>
    %30 = arith.mulf %1, %29 : vector<64x128xf32>
    %31 = arith.addf %28, %30 : vector<64x128xf32>
    %c2_i32_9 = arith.constant 2 : i32
    %32 = tpu.dynamic_rotate %31 by %c2_i32_9 dim 0 : vector<64x128xf32>, i32 -> vector<64x128xf32>
    %c62_i32 = arith.constant 62 : i32
    %33 = tpu.dynamic_rotate %31 by %c62_i32 dim 0 : vector<64x128xf32>, i32 -> vector<64x128xf32>
    %cst_10 = arith.constant 0.00941209216 : f32
    %34 = vector.broadcast %cst_10 : f32 to vector<64x128xf32>
    %35 = arith.mulf %4, %34 : vector<64x128xf32>
    %cst_11 = arith.constant 0.0462544113 : f32
    %36 = vector.broadcast %cst_11 : f32 to vector<64x128xf32>
    %37 = arith.mulf %7, %36 : vector<64x128xf32>
    %38 = arith.addf %35, %37 : vector<64x128xf32>
    %cst_12 = arith.constant 0.0341756195 : f32
    %39 = vector.broadcast %cst_12 : f32 to vector<64x128xf32>
    %40 = arith.mulf %10, %39 : vector<64x128xf32>
    %41 = arith.addf %38, %40 : vector<64x128xf32>
    %cst_13 = arith.constant 0.0154799959 : f32
    %42 = vector.broadcast %cst_13 : f32 to vector<64x128xf32>
    %43 = arith.mulf %1, %42 : vector<64x128xf32>
    %44 = arith.addf %41, %43 : vector<64x128xf32>
    %c1_i32_14 = arith.constant 1 : i32
    %45 = tpu.dynamic_rotate %44 by %c1_i32_14 dim 0 : vector<64x128xf32>, i32 -> vector<64x128xf32>
    %c63_i32 = arith.constant 63 : i32
    %46 = tpu.dynamic_rotate %44 by %c63_i32 dim 0 : vector<64x128xf32>, i32 -> vector<64x128xf32>
    %cst_15 = arith.constant 0.0154799959 : f32
    %47 = vector.broadcast %cst_15 : f32 to vector<64x128xf32>
    %48 = arith.mulf %4, %47 : vector<64x128xf32>
    %cst_16 = arith.constant 0.0489244312 : f32
    %49 = vector.broadcast %cst_16 : f32 to vector<64x128xf32>
    %50 = arith.mulf %7, %49 : vector<64x128xf32>
    %51 = arith.addf %48, %50 : vector<64x128xf32>
    %cst_17 = arith.constant 0.0154799959 : f32
    %52 = vector.broadcast %cst_17 : f32 to vector<64x128xf32>
    %53 = arith.mulf %10, %52 : vector<64x128xf32>
    %54 = arith.addf %51, %53 : vector<64x128xf32>
    %55 = arith.addf %19, %20 : vector<64x128xf32>
    %56 = arith.addf %32, %33 : vector<64x128xf32>
    %57 = arith.addf %45, %46 : vector<64x128xf32>
    %58 = arith.addf %55, %56 : vector<64x128xf32>
    %59 = arith.addf %57, %54 : vector<64x128xf32>
    %60 = arith.addf %58, %59 : vector<64x128xf32>
    %cst_18 = arith.constant 1.500000e-01 : f32
    %61 = vector.broadcast %cst_18 : f32 to vector<64x128xf32>
    %62 = arith.subf %60, %61 : vector<64x128xf32>
    %63 = arith.mulf %62, %62 : vector<64x128xf32>
    %cst_19 = arith.constant -2222.22217 : f32
    %64 = vector.broadcast %cst_19 : f32 to vector<64x128xf32>
    %65 = arith.mulf %63, %64 : vector<64x128xf32>
    %66 = math.exp %65 : vector<64x128xf32>
    %cst_20 = arith.constant 2.000000e+00 : f32
    %67 = vector.broadcast %cst_20 : f32 to vector<64x128xf32>
    %68 = arith.mulf %66, %67 : vector<64x128xf32>
    %cst_21 = arith.constant 1.000000e+00 : f32
    %69 = vector.broadcast %cst_21 : f32 to vector<64x128xf32>
    %70 = arith.subf %68, %69 : vector<64x128xf32>
    %cst_22 = arith.constant 1.000000e-01 : f32
    %71 = vector.broadcast %cst_22 : f32 to vector<64x128xf32>
    %72 = arith.mulf %71, %70 : vector<64x128xf32>
    %73 = arith.addf %1, %72 : vector<64x128xf32>
    %cst_23 = arith.constant 0.000000e+00 : f32
    %cst_24 = arith.constant 1.000000e+00 : f32
    %74 = vector.broadcast %cst_23 : f32 to vector<64x128xf32>
    %75 = arith.maximumf %74, %73 : vector<64x128xf32>
    %76 = vector.broadcast %cst_24 : f32 to vector<64x128xf32>
    %77 = arith.minimumf %76, %75 : vector<64x128xf32>
    %c0_25 = arith.constant 0 : index
    %c0_26 = arith.constant 0 : index
    %c0_27 = arith.constant 0 : index
    %78 = vector.load %arg2[%c0_25, %c0_26, %c0_27] : memref<1x64x128xf32, #tpu.memory_space<vmem>>, vector<1x64x128xf32>
    %79 = vector.shape_cast %78 : vector<1x64x128xf32> to vector<64x128xf32>
    %80 = vector.shape_cast %77 : vector<64x128xf32> to vector<1x64x128xf32>
    tpu.vector_store %arg2[%c0_25, %c0_26, %c0_27], %80 {strides = array<i32>} : memref<1x64x128xf32, #tpu.memory_space<vmem>>, vector<1x64x128xf32>,
    return
  }
  func.func @transform_0(%arg0: i32) -> (i32, i32, i32) {
    %c0_i32 = arith.constant 0 : i32
    %c0_i32_0 = arith.constant 0 : i32
    %c0_i32_1 = arith.constant 0 : i32
    return %arg0, %c0_i32, %c0_i32_0 : i32, i32, i32
  }
  func.func @transform_1(%arg0: i32) -> (i32, i32, i32) {
    %c0_i32 = arith.constant 0 : i32
    %c0_i32_0 = arith.constant 0 : i32
    %c0_i32_1 = arith.constant 0 : i32
    return %arg0, %c0_i32, %c0_i32_0 : i32, i32, i32
  }
}

</mosaic_0001>

<bundles_post_ra>
// kernel: tpu_custom_call.1
= control target key start
LH: loop header
LB: loop body
LE: loop exit
PB: predicated region body
PF: predicated region fallthrough
CT: control target
= control target key end

     0   :  { %6 = vsyncpa [#allocation3], 0  ;;  %s1867_s0 = inlined_call_operand.hbm [shape: f32[2,64,128], index: 0, kind: input, shape index: {}]   ;;  %s1868_s1 = inlined_call_operand.hbm [shape: f32[2,64,128], index: 1, kind: output, shape index: {}]  }
   0x1   :  { %8 = vsyncpa [#allocation3 + $0x1], 0 }
   0x2   :  { %9 = vsyncpa [#allocation4], 0 }
   0x3   :  { %11 = vsyncpa [#allocation4 + $0x1], 0  ;;  %s1012_s6 = smov 0   ;;  %s1014_s7 = smov 0  }
   0x4   :  { %s1016_s8 = smov 0   ;;  %s1018_s9 = smov 0  }
   0x5 LB: > { %s1033_s10 = sadd.s32 4294967295, %s988_s9   ;;  %s782_s11 = sadd.s32 4294967294, %s988_s9   ;;  %s988_s9 = sphi %s1018_s9, %s1950_s9   ;;  %s984_s8 = sphi %s1016_s8, %s1949_s8   ;;  %s980_s7 = sphi %s1014_s7, %s1948_s7   ;;  %s976_s6 = sphi %s1012_s6, %s1947_s6  }
   0x6   : > { %s1037_s12 = sadd.s32 1, %s988_s9   ;;  %s24_s13 = sadd.s32 1, %s984_s8 }
   0x7   : > { %s21_s14 = ssub.s32 %s988_s9, %s1037_s12  ;;  %p31_p0 = scmp.ne.s32.totalorder %s984_s8, %s980_s7 }
   0x8   : > { %p22_p1 = scmp.eq.s32.totalorder %s21_s14, 0  ;;  %p32_p2 = scmp.eq.s32.totalorder %s988_s9, 0 }
   0x9   : > { %p37_p3 = scmp.ne.s32.totalorder %s980_s7, %s976_s6  ;;  %p38_p4 = scmp.eq.s32.totalorder %s1033_s10, 0 }
   0xa   : > { %s1049_s15 = scalar_select %p22_p1, %s984_s8, %s24_s13  }
   0xb   : > { %p1051_p5 = por %p32_p2, %p31_p0  ;;  %p1055_p6 = por %p38_p4, %p37_p3 }
   0xc   : > { %p61_p7 = scmp.eq.s32.totalorder %s1033_s10, 1  ;;  %p67_p8 = scmp.eq.s32.totalorder %s782_s11, 1 }
   0xd   : > { %p826_p10 = scmp.lt.s32.totalorder %s988_s9, 2  ;;  %s87_s20 = sand.u32 1, %s984_s8  }
   0xe   : > { %p1062_p11 = por %p61_p7, %p31_p0  ;;  %p1066_p12 = por %p67_p8, %p37_p3 }
   0xf   : > { %s812_s21 = sshll.u32 %s988_s9, 10  ;;  %s785_s22 = sshll.u32 %s87_s20, 6 }
  0x10   : > { %s1892_s18 = scalar_select %p1062_p11, 1, 0 }
  0x11   : > { %s1893_s19 = scalar_select %p1066_p12, 1, 0 }
  0x12   : > { %s1075_s25 = scalar_lea.hbm %s1867_s0, %s812_s21  ;;  %s91_s26 = scalar_lea.vmem [#allocation2], %s785_s22 }
  0x13   : > { %s98_s27 = sshll.u32 %s91_s26, 4  ;;  %p1079_p13 = pnand %p826_p10, %p1051_p5  ;;  %s1083_s27 = int_to_ptr.vmem [resolvable:$true] %s98_s27 }
  0x14   : > { %s1085_s29 = scalar_lea.sflag [#allocation3], %s87_s20  ;;  %s892_s30 = scalar_lea.hbm %s1075_s25, 1024 }
  0x15   : > { %p893_p0 = scmp.ne.s32.totalorder %s1075_s25, %s892_s30  ;;  %p894_p1 = pneg %p1079_p13 }
  0x16   : > { %s897_s4 = scalar_lea.hbm %s1867_s0, 2048  ;;  %p898_p4 = scmp.lt.u32.totalorder %s1075_s25, %s1867_s0 }
  0x17   : > { %p895_p2 = pnand %p894_p1, %p893_p0  ;;  %p899_p5 = scmp.lt.u32.totalorder %s897_s4, %s892_s30 }
  0x18   : > { %p901_p8 = scmp.lt.u32.totalorder %s892_s30, %s1075_s25 }
  0x19   : > { %p896_p3 = pneg %p895_p2  ;;  %p900_p7 = por %p899_p5, %p898_p4 }
  0x1b   : > { %p902_p10 = por %p901_p8, %p900_p7 }
  0x1d   : > { %p903_p9 = pnand %p902_p10, %p896_p3 }
  0x1f   : > { %906 = shalt.err (!%p903_p9)
}
  0x20   : > { %s907_s13 = scalar_lea.vmem %s1083_s27, 1024  ;;  %s990_s14 = smov [#allocation2]  }
  0x21   : > { %p908_p0 = scmp.ne.s32.totalorder %s1083_s27, %s907_s13  ;;  %s912_s16 = sshll.u32 %s990_s14, 4  ;;  %s913_s16 = int_to_ptr.vmem [resolvable:$false] %s912_s16 }
  0x22   : > { %s914_s20 = scalar_lea.vmem %s913_s16, 2048  ;;  %p915_p11 = scmp.lt.s32.totalorder %s1083_s27, %s913_s16 }
  0x23   : > { %p910_p2 = pnand %p908_p0, %p894_p1  ;;  %p916_p4 = scmp.lt.s32.totalorder %s914_s20, %s907_s13 }
  0x25   : > { %p911_p12 = pneg %p910_p2  ;;  %p917_p5 = por %p916_p4, %p915_p11 }
  0x27   : > { %p918_p7 = pnand %p917_p5, %p911_p12 }
  0x29   : > { %921 = shalt.err (!%p918_p7)
}
  0x2a   : > { %s991_s21 = smov 128   ;;  %s992_s22 = smov 8  }
  0x2b   : > { %821 = dma.hbm_to_vmem [thread:$0]  (!%p1079_p13), %s1075_s25, 1024, %s1083_s27, %s1085_s29, %s991_s21, %s991_s21, %s992_s22  }
  0x2c   : > { %p788_p9 = scmp.ge.s32.totalorder %s988_s9, 1  ;;  %p106_p1 = scmp.lt.s32.totalorder %s988_s9, 3 }
  0x2e   : > { %p107_p3 = pnand %p788_p9, %p106_p1 }
  0x30   : > { %110 = sbr.rel (%p107_p3) target bundleno = 381 (0x17d), region = 24 }
  0x37   : > { %s1116_s23 = sand.u32 1, %s980_s7  }
  0x38   : > { %s789_s24 = sshll.u32 %s1116_s23, 6  ;;  %s113_s26 = scalar_lea.sflag [#allocation3], %s1116_s23 }
  0x39   : > { %s1122_s30 = scalar_lea.vmem [#allocation2], %s789_s24 }
  0x3a   : > { %967 = dma.done.wait (%p1055_p6), %s113_s26, 1024  }
  0x3b   : > { %969 = vsyncadd (%p1055_p6), %s113_s26, 4294966272  ;;  %v1129_v0 = vld [vmem:[%s1122_s30 + $0x10] sm:$0xff]  ;;  %v1132_v1 = vld [vmem:[%s1122_s30] sm:$0xff]  ;;  %s993_s25 = smov 3   ;;  %s994_s17 = smov 125   ;;  %v311_v42 = vlaneseq }
  0x3c   : > { %1895 = vst [vmem:[#allocation8_spill] sm:$0xff] %v1129_v0  ;;  %147 = vrot.lane.b32.xlu1 %v1129_v0, %s993_s25  ;;  %143 = vrot.lane.b32.xlu0 %v1132_v1, %s993_s25  ;;  %v1137_v2 = vld [vmem:[%s1122_s30 + $0x18] sm:$0xff]  ;;  %v1140_v3 = vld [vmem:[%s1122_s30 + $0x8] sm:$0xff]  ;;  %s995_s27 = smov 2   ;;  %s996_s28 = smov 126  }
  0x3d   : > { %1896 = vst [vmem:[#allocation9_spill] sm:$0xff] %v1140_v3  ;;  %v1145_v4 = vld [vmem:[%s1122_s30 + $0x28] sm:$0xff]  ;;  %v1148_v5 = vld [vmem:[%s1122_s30 + $0x20] sm:$0xff]  ;;  %v1153_v6 = vld [vmem:[%s1122_s30 + $0x38] sm:$0xff]  ;;  %s997_s29 = smov 1   ;;  %s998_s2 = smov 127  }
  0x3e   : > { %v1156_v7 = vld [vmem:[%s1122_s30 + $0x30] sm:$0xff]  ;;  %v1217_v43 = vmul.f32 0.015479996, %v1140_v3  ;;  %v1220_v44 = vmul.f32 0.04892443, %v1140_v3  ;;  %v1232_v49 = vshrl.u32 %v311_v42, 7 }
  0x3f   : > { %v1223_v45 = vmul.f32 0.015479996, %v1132_v1  ;;  %v1226_v46 = vmul.f32 0.04892443, %v1132_v1  ;;  %v1235_v50 = vmul.f32 0.015479996, %v1137_v2 }
  0x40   : > { %149 = vrot.lane.b32.xlu1 %v1137_v2, %s993_s25  ;;  %145 = vrot.lane.b32.xlu0 %v1140_v3, %s993_s25  ;;  %v1238_v51 = vmul.f32 0.04892443, %v1137_v2  ;;  %v1241_v52 = vmul.f32 0.015479996, %v1129_v0  ;;  %v1244_v53 = vmul.f32 0.04892443, %v1129_v0 }
  0x41   : > { %v1247_v54 = vmul.f32 0.015479996, %v1145_v4  ;;  %v1250_v56 = vmul.f32 0.04892443, %v1145_v4  ;;  %v1253_v57 = vmul.f32 0.015479996, %v1148_v5 }
  0x42   : > { %1897 = vst [vmem:[#allocation10_spill] sm:$0xff] %v1241_v52  ;;  %1898 = vst [vmem:[#allocation11_spill] sm:$0xff] %v1244_v53  ;;  %v1256_v58 = vmul.f32 0.04892443, %v1148_v5  ;;  %v1259_v60 = vmul.f32 0.015479996, %v1153_v6 }
  0x43   : > { %1899 = vst [vmem:[#allocation12_spill] sm:$0xff] %v1247_v54  ;;  %1900 = vst [vmem:[#allocation13_spill] sm:$0xff] %v1250_v56  ;;  %v1262_v61 = vmul.f32 0.04892443, %v1153_v6  ;;  %v1265_v62 = vmul.f32 0.015479996, %v1156_v7 }
  0x44   : > { %153 = vrot.lane.b32.xlu1 %v1145_v4, %s993_s25  ;;  %151 = vrot.lane.b32.xlu0 %v1148_v5, %s993_s25  ;;  %1901 = vst [vmem:[#allocation14_spill] sm:$0xff] %v1253_v57  ;;  %1902 = vst [vmem:[#allocation15_spill] sm:$0xff] %v1256_v58  ;;  %vm403_vm0 = vcmp.lt.s32.totalorder %v1232_v49, 2  ;;  %vm420_vm1 = vcmp.lt.s32.totalorder %v1232_v49, 6  ;;  %vm485_vm2 = vcmp.lt.s32.totalorder %v1232_v49, 1  ;;  %vm502_vm3 = vcmp.lt.s32.totalorder %v1232_v49, 7 }
  0x45   : > { %1903 = vst [vmem:[#allocation16_spill] sm:$0xff] %v1259_v60  ;;  %1904 = vst [vmem:[#allocation17_spill] sm:$0xff] %v1262_v61  ;;  %vm313_vm4 = vcmp.lt.s32.totalorder %v1232_v49, 3  ;;  %vm330_vm5 = vcmp.lt.s32.totalorder %v1232_v49, 5  ;;  %s1774_s3 = scalar_lea.vmem [#allocation5], %s789_s24  ;;  %s813_s4 = sshll.u32 %s1033_s10, 10 }
  0x46   : > { %1905 = vst [vmem:[#allocation18_spill] sm:$0xff] %v1265_v62  ;;  %s709_s5 = sshll.u32 %s1774_s3, 4  ;;  %s1818_s14 = scalar_lea.hbm %s1868_s1, %s813_s4  ;;  %s1820_s5 = int_to_ptr.vmem [resolvable:$true] %s709_s5 }
  0x47   : > { %s696_s10 = scalar_lea.sflag [#allocation4], %s1116_s23  ;;  %s922_s16 = scalar_lea.vmem %s1820_s5, 1024 }
  0x48   : > { %157 = vrot.lane.b32.xlu1 %v1153_v6, %s993_s25  ;;  %155 = vrot.lane.b32.xlu0 %v1156_v7, %s993_s25  ;;  %p923_p6 = scmp.ne.s32.totalorder %s1820_s5, %s922_s16  ;;  %p1944_p11 = scmp.ne.s32.totalorder %s1892_s18, 0 }
  0x49   : > { %s999_s20 = smov [#allocation5]  }
  0x4a   : > { %p924_p12 = pnand %p923_p6, %p1944_p11  ;;  %s926_s21 = sshll.u32 %s999_s20, 4  ;;  %s927_s21 = int_to_ptr.vmem [resolvable:$false] %s926_s21 }
  0x4b   : > { %s928_s22 = scalar_lea.vmem %s927_s21, 2048  ;;  %p929_p8 = scmp.lt.s32.totalorder %s1820_s5, %s927_s21 }
  0x4c   : > { %161 = vrot.lane.b32.xlu1 %v1140_v3, %s994_s17  ;;  %159 = vrot.lane.b32.xlu0 %v1132_v1, %s994_s17  ;;  %p925_p13 = pneg %p924_p12  ;;  %p930_p10 = scmp.lt.s32.totalorder %s928_s22, %s922_s16 }
  0x4e   : > { %p931_p0 = por %p930_p10, %p929_p8 }
  0x50   : > { %165 = vrot.lane.b32.xlu1 %v1137_v2, %s994_s17  ;;  %163 = vrot.lane.b32.xlu0 %v1129_v0, %s994_s17  ;;  %p932_p2 = pnand %p931_p0, %p925_p13 }
  0x54   : > { %169 = vrot.lane.b32.xlu1 %v1145_v4, %s994_s17  ;;  %167 = vrot.lane.b32.xlu0 %v1148_v5, %s994_s17 }
  0x58   : > { %173 = vrot.lane.b32.xlu1 %v1153_v6, %s994_s17  ;;  %171 = vrot.lane.b32.xlu0 %v1156_v7, %s994_s17 }
  0x5c   : > { %185 = vrot.lane.b32.xlu1 %v1140_v3, %s995_s27  ;;  %183 = vrot.lane.b32.xlu0 %v1132_v1, %s995_s27 }
  0x60   : > { %189 = vrot.lane.b32.xlu1 %v1137_v2, %s995_s27  ;;  %187 = vrot.lane.b32.xlu0 %v1129_v0, %s995_s27 }
  0x64   : > { %193 = vrot.lane.b32.xlu1 %v1145_v4, %s995_s27  ;;  %191 = vrot.lane.b32.xlu0 %v1148_v5, %s995_s27 }
  0x68   : > { %197 = vrot.lane.b32.xlu1 %v1153_v6, %s995_s27  ;;  %195 = vrot.lane.b32.xlu0 %v1156_v7, %s995_s27 }
  0x6c   : > { %201 = vrot.lane.b32.xlu1 %v1140_v3, %s996_s28  ;;  %199 = vrot.lane.b32.xlu0 %v1132_v1, %s996_s28 }
  0x70   : > { %205 = vrot.lane.b32.xlu1 %v1137_v2, %s996_s28  ;;  %203 = vrot.lane.b32.xlu0 %v1129_v0, %s996_s28 }
  0x74   : > { %209 = vrot.lane.b32.xlu1 %v1145_v4, %s996_s28  ;;  %207 = vrot.lane.b32.xlu0 %v1148_v5, %s996_s28 }
  0x78   : > { %213 = vrot.lane.b32.xlu1 %v1153_v6, %s996_s28  ;;  %211 = vrot.lane.b32.xlu0 %v1156_v7, %s996_s28 }
  0x7c   : > { %225 = vrot.lane.b32.xlu1 %v1140_v3, %s997_s29  ;;  %223 = vrot.lane.b32.xlu0 %v1132_v1, %s997_s29 }
  0x80   : > { %229 = vrot.lane.b32.xlu1 %v1137_v2, %s997_s29  ;;  %227 = vrot.lane.b32.xlu0 %v1129_v0, %s997_s29 }
  0x84   : > { %233 = vrot.lane.b32.xlu1 %v1145_v4, %s997_s29  ;;  %231 = vrot.lane.b32.xlu0 %v1148_v5, %s997_s29 }
  0x88   : > { %237 = vrot.lane.b32.xlu1 %v1153_v6, %s997_s29  ;;  %235 = vrot.lane.b32.xlu0 %v1156_v7, %s997_s29 }
  0x8c   : > { %241 = vrot.lane.b32.xlu1 %v1140_v3, %s998_s2  ;;  %239 = vrot.lane.b32.xlu0 %v1132_v1, %s998_s2 }
  0x90   : > { %245 = vrot.lane.b32.xlu1 %v1137_v2, %s998_s2  ;;  %243 = vrot.lane.b32.xlu0 %v1129_v0, %s998_s2 }
  0x94   : > { %249 = vrot.lane.b32.xlu1 %v1145_v4, %s998_s2  ;;  %247 = vrot.lane.b32.xlu0 %v1148_v5, %s998_s2 }
  0x98   : > { %253 = vrot.lane.b32.xlu1 %v1153_v6, %s998_s2  ;;  %251 = vrot.lane.b32.xlu0 %v1156_v7, %s998_s2 }
  0xae   : > { %v148_v8 = vpop.permute.xlu1 %147  ;;  %v144_v9 = vpop.permute.xlu0 %143 }
  0xb2   : > { %v150_v10 = vpop.permute.xlu1 %149  ;;  %v146_v11 = vpop.permute.xlu0 %145 }
  0xb6   : > { %v154_v12 = vpop.permute.xlu1 %153  ;;  %v152_v13 = vpop.permute.xlu0 %151 }
  0xba   : > { %v158_v14 = vpop.permute.xlu1 %157  ;;  %v156_v15 = vpop.permute.xlu0 %155 }
  0xbe   : > { %v162_v16 = vpop.permute.xlu1 %161  ;;  %v160_v17 = vpop.permute.xlu0 %159 }
  0xbf   : > { %v176_v18 = vadd.f32 %v162_v16, %v146_v11  ;;  %v175_v19 = vadd.f32 %v160_v17, %v144_v9  ;;  %v1270_v9 = vmul.f32 0.04892443, %v1156_v7 }
  0xc1   : > { %v340_v63 = vmul.f32 0.0007818706, %v176_v18  ;;  %v430_v1 = vmul.f32 0.009412092, %v176_v18  ;;  %1906 = vst [vmem:[#allocation19_spill] sm:$0xff] %v1270_v9 }
  0xc2   : > { %v166_v20 = vpop.permute.xlu1 %165  ;;  %v164_v21 = vpop.permute.xlu0 %163  ;;  %v512_v5 = vmul.f32 0.015479996, %v176_v18  ;;  %v511_v11 = vmul.f32 0.015479996, %v175_v19 }
  0xc3   : > { %v178_v55 = vadd.f32 %v166_v20, %v150_v10  ;;  %v177_v59 = vadd.f32 %v164_v21, %v148_v8  ;;  %v339_v10 = vmul.f32 0.0007818706, %v175_v19  ;;  %v429_v8 = vmul.f32 0.009412092, %v175_v19 }
  0xc5   : > { %v1282_v16 = vmul.f32 0.009412092, %v177_v59  ;;  %v1284_v17 = vmul.f32 0.015479996, %v177_v59 }
  0xc6   : > { %v170_v22 = vpop.permute.xlu1 %169  ;;  %v168_v23 = vpop.permute.xlu0 %167 }
  0xc7   : > { %v180_v24 = vadd.f32 %v170_v22, %v154_v12  ;;  %v1200_v25 = vadd.f32 %v168_v23, %v152_v13  ;;  %v1272_v12 = vmul.f32 0.0007818706, %v178_v55  ;;  %v1274_v13 = vmul.f32 0.009412092, %v178_v55 }
  0xc9   : > { %v1286_v7 = vmul.f32 0.0007818706, %v180_v24  ;;  %v1288_v18 = vmul.f32 0.009412092, %v180_v24  ;;  %v1294_v22 = vmul.f32 0.015479996, %v180_v24 }
  0xca   : > { %v174_v26 = vpop.permute.xlu1 %173  ;;  %v172_v27 = vpop.permute.xlu0 %171  ;;  %v1297_v23 = vmul.f32 0.0007818706, %v1200_v25 }
  0xcb   : > { %v1202_v28 = vadd.f32 %v174_v26, %v158_v14  ;;  %v181_v29 = vadd.f32 %v172_v27, %v156_v15  ;;  %v1278_v14 = vmul.f32 0.015479996, %v178_v55  ;;  %v1280_v15 = vmul.f32 0.0007818706, %v177_v59 }
  0xcc   : > { %v1300_v26 = vmul.f32 0.009412092, %v1200_v25 }
  0xcd   : > { %v345_v27 = vmul.f32 0.0007818706, %v181_v29  ;;  %v517_v59 = vmul.f32 0.015479996, %v181_v29  ;;  %v1320_v60 = vmul.f32 0.0007818706, %v1202_v28 }
  0xce   : > { %v186_v30 = vpop.permute.xlu1 %185  ;;  %v184_v31 = vpop.permute.xlu0 %183 }
  0xd2   : > { %v1204_v32 = vpop.permute.xlu1 %189  ;;  %v1206_v33 = vpop.permute.xlu0 %187 }
  0xd6   : > { %v1208_v34 = vpop.permute.xlu1 %193  ;;  %v1210_v35 = vpop.permute.xlu0 %191 }
  0xda   : > { %v1212_v36 = vpop.permute.xlu1 %197  ;;  %v196_v37 = vpop.permute.xlu0 %195 }
  0xde   : > { %v202_v38 = vpop.permute.xlu1 %201  ;;  %v200_v39 = vpop.permute.xlu0 %199 }
  0xdf   : > { %v216_v20 = vadd.f32 %v202_v38, %v186_v30  ;;  %v215_v42 = vadd.f32 %v200_v39, %v184_v31 }
  0xe1   : > { %v348_v24 = vmul.f32 0.023043213, %v216_v20  ;;  %v438_v0 = vmul.f32 0.04625441, %v216_v20  ;;  %v520_v61 = vmul.f32 0.04892443, %v216_v20 }
  0xe2   : > { %v206_v40 = vpop.permute.xlu1 %205  ;;  %v1214_v41 = vpop.permute.xlu0 %203  ;;  %v347_v58 = vmul.f32 0.023043213, %v215_v42  ;;  %v519_v57 = vmul.f32 0.04892443, %v215_v42 }
  0xe3   : > { %v218_v31 = vadd.f32 %v206_v40, %v1204_v32  ;;  %v264_v32 = vmul.f32 0.0007818706, %v216_v20  ;;  %v356_v40 = vadd.f32 %v348_v24, %v340_v63 }
  0xe5   : > { %v522_v56 = vmul.f32 0.04892443, %v218_v31 }
  0xe6   : > { %v1228_v47 = vpop.permute.xlu1 %209  ;;  %v1230_v48 = vpop.permute.xlu0 %207 }
  0xe7   : > { %v219_v63 = vadd.f32 %v1230_v48, %v1210_v35  ;;  %v1361_v48 = vadd.f32 %v522_v56, %v1278_v14 }
  0xea   : > { %v1267_v2 = vpop.permute.xlu1 %213  ;;  %v212_v4 = vpop.permute.xlu0 %211 }
  0xeb   : > { %v1276_v6 = vadd.f32 %v212_v4, %v196_v37  ;;  %v435_v37 = vmul.f32 0.009412092, %v181_v29  ;;  %v1306_v4 = vmul.f32 0.015479996, %v1200_v25  ;;  %v1323_v25 = vmul.f32 0.009412092, %v1202_v28 }
  0xed   : > { %v353_v55 = vmul.f32 0.023043213, %v1276_v6  ;;  %v443_v30 = vmul.f32 0.04625441, %v1276_v6  ;;  %v525_v38 = vmul.f32 0.04892443, %v1276_v6 }
  0xee   : > { %v1290_v19 = vpop.permute.xlu1 %225  ;;  %v1292_v21 = vpop.permute.xlu0 %223 }
  0xef   : > { %v1308_v3 = vadd.f32 %v353_v55, %v345_v27  ;;  %v1315_v39 = vadd.f32 %v443_v30, %v435_v37  ;;  %v1317_v29 = vadd.f32 %v525_v38, %v517_v59  ;;  %v217_v27 = vadd.f32 %v1214_v41, %v1206_v33 }
  0xf0   : > { %v1328_v55 = vmul.f32 0.015479996, %v1202_v28  ;;  %v1330_v37 = vmul.f32 0.0007818706, %v215_v42  ;;  %v220_v59 = vadd.f32 %v1228_v47, %v1208_v34  ;;  %v350_v33 = vmul.f32 0.023043213, %v218_v31 }
  0xf1   : > { %1907 = vst [vmem:[#allocation20_spill] sm:$0xff] %v1308_v3  ;;  %1908 = vst [vmem:[#allocation21_spill] sm:$0xff] %v1315_v39  ;;  %v437_v3 = vmul.f32 0.04625441, %v215_v42  ;;  %v1338_v39 = vadd.f32 %v520_v61, %v512_v5  ;;  %v440_v41 = vmul.f32 0.04625441, %v218_v31  ;;  %v355_v28 = vadd.f32 %v347_v58, %v339_v10 }
  0xf2   : > { %v1310_v9 = vpop.permute.xlu1 %229  ;;  %v1312_v62 = vpop.permute.xlu0 %227  ;;  %1909 = vst [vmem:[#allocation22_spill] sm:$0xff] %v1317_v29  ;;  %v446_v29 = vadd.f32 %v438_v0, %v430_v1  ;;  %v349_v54 = vmul.f32 0.023043213, %v217_v27  ;;  %v1342_v42 = vadd.f32 %v519_v57, %v511_v11  ;;  %v439_v24 = vmul.f32 0.04625441, %v217_v27 }
  0xf3   : > { %v445_v20 = vadd.f32 %v437_v3, %v429_v8  ;;  %v521_v34 = vmul.f32 0.04892443, %v217_v27  ;;  %v352_v47 = vmul.f32 0.023043213, %v220_v59  ;;  %v442_v53 = vmul.f32 0.04625441, %v220_v59 }
  0xf4   : > { %v524_v52 = vmul.f32 0.04892443, %v220_v59  ;;  %v222_v0 = vadd.f32 %v1267_v2, %v1212_v36  ;;  %v1350_v58 = vmul.f32 0.0007818706, %v218_v31  ;;  %v1353_v5 = vadd.f32 %v350_v33, %v1272_v12 }
  0xf5   : > { %v1356_v3 = vadd.f32 %v440_v41, %v1274_v13  ;;  %v1358_v35 = vmul.f32 0.0007818706, %v217_v27  ;;  %v1364_v57 = vadd.f32 %v349_v54, %v1280_v15  ;;  %v351_v36 = vmul.f32 0.023043213, %v219_v63 }
  0xf6   : > { %v1334_v30 = vpop.permute.xlu1 %233  ;;  %v1336_v38 = vpop.permute.xlu0 %231  ;;  %v441_v2 = vmul.f32 0.04625441, %v219_v63  ;;  %v1367_v10 = vadd.f32 %v439_v24, %v1282_v16  ;;  %v1370_v8 = vadd.f32 %v521_v34, %v1284_v17  ;;  %v1372_v11 = vmul.f32 0.0007818706, %v220_v59 }
  0xf7   : > { %v523_v12 = vmul.f32 0.04892443, %v219_v63  ;;  %v1375_v13 = vadd.f32 %v352_v47, %v1286_v7  ;;  %v1378_v56 = vadd.f32 %v442_v53, %v1288_v18  ;;  %v1381_v54 = vadd.f32 %v524_v52, %v1294_v22 }
  0xf8   : > { %v354_v14 = vmul.f32 0.023043213, %v222_v0  ;;  %v1383_v16 = vmul.f32 0.0007818706, %v219_v63  ;;  %v1385_v27 = vmul.f32 0.0007818706, %v222_v0  ;;  %v1390_v7 = vadd.f32 %v351_v36, %v1297_v23 }
  0xf9   : > { %v1393_v53 = vadd.f32 %v441_v2, %v1300_v26  ;;  %v444_v18 = vmul.f32 0.04625441, %v222_v0  ;;  %v526_v52 = vmul.f32 0.04892443, %v222_v0  ;;  %v1398_v22 = vadd.f32 %v523_v12, %v1306_v4 }
  0xfa   : > { %v1346_v61 = vpop.permute.xlu1 %237  ;;  %v1348_v1 = vpop.permute.xlu0 %235 }
  0xfb   : > { %v1407_v36 = vadd.f32 %v444_v18, %v1323_v25  ;;  %v1424_v25 = vadd.f32 %v526_v52, %v1328_v55 }
  0xfe   : > { %v242_v15 = vpop.permute.xlu1 %241  ;;  %v240_v31 = vpop.permute.xlu0 %239 }
  0xff   : > { %v256_v17 = vadd.f32 %v242_v15, %v1290_v19  ;;  %v255_v59 = vadd.f32 %v240_v31, %v1292_v21  ;;  %v1401_v21 = vadd.f32 %v354_v14, %v1320_v60  ;;  %v1410_v60 = vmul.f32 0.0007818706, %v1276_v6 }
 0x101   : > { %v272_v33 = vmul.f32 0.009412092, %v256_v17  ;;  %v364_v41 = vmul.f32 0.04625441, %v256_v17  ;;  %v454_v19 = vmul.f32 0.03417562, %v256_v17 }
 0x102   : > { %v536_v23 = vmul.f32 0.015479996, %v256_v17  ;;  %v271_v26 = vmul.f32 0.009412092, %v255_v59  ;;  %v363_v63 = vmul.f32 0.04625441, %v255_v59  ;;  %v246_v0 = vpop.permute.xlu1 %245 }
 0x103   : > { %v280_v24 = vadd.f32 %v272_v33, %v264_v32  ;;  %v372_v34 = vadd.f32 %v364_v41, %v356_v40  ;;  %v462_v47 = vadd.f32 %v454_v19, %v446_v29  ;;  %v453_v4 = vmul.f32 0.03417562, %v255_v59 }
 0x104   : > { %v279_v2 = vadd.f32 %v271_v26, %v1330_v37  ;;  %v371_v12 = vadd.f32 %v363_v63, %v355_v28  ;;  %v258_v28 = vadd.f32 %v246_v0, %v1310_v9  ;;  %v535_v31 = vmul.f32 0.015479996, %v255_v59 }
 0x105   : > { %v1414_v14 = vadd.f32 %v1217_v43, %v280_v24  ;;  %v1417_v32 = vadd.f32 %v1220_v44, %v372_v34  ;;  %v1420_v29 = vadd.f32 %v462_v47, %v1217_v43  ;;  %v461_v40 = vadd.f32 %v453_v4, %v445_v20  ;;  %v244_v20 = vpop.permute.xlu0 %243 }
 0x106   : > { %v1427_v6 = vadd.f32 %v1223_v45, %v279_v2  ;;  %v1430_v37 = vadd.f32 %v1226_v46, %v371_v12  ;;  %v1436_v43 = vadd.f32 %v536_v23, %v1338_v39  ;;  %v274_v41 = vmul.f32 0.009412092, %v258_v28  ;;  %v250_v34 = vpop.permute.xlu1 %249 }
 0x107   : > { %v1886_v44 = vrot.slane %v1417_v32, 6  ;;  %v1885_v15 = vrot.slane %v1417_v32, 2  ;;  %v304_v55 = vrot.slane %v1414_v14, 5  ;;  %v323_v17 = vrot.slane %v1414_v14, 3 }
 0x108   : > { %v1884_v18 = vrot.slane %v1420_v29, 7  ;;  %v1883_v46 = vrot.slane %v1420_v29, 1  ;;  %v1880_v52 = vrot.slane %v1430_v37, 6  ;;  %v1879_v9 = vrot.slane %v1430_v37, 2 }
 0x109   : > { %v1445_v33 = vadd.f32 %v461_v40, %v1223_v45  ;;  %v1882_v39 = vrot.slane %v1427_v6, 5  ;;  %v1881_v59 = vrot.slane %v1427_v6, 3  ;;  %v366_v19 = vmul.f32 0.04625441, %v258_v28 }
 0x10a   : > { %v456_v23 = vmul.f32 0.03417562, %v258_v28  ;;  %v1455_v26 = vsel %vm403_vm0, %v1880_v52, %v1886_v44  ;;  %v1463_v45 = vsel %vm420_vm1, %v1879_v9, %v1885_v15  ;;  %v282_v47 = vadd.f32 %v274_v41, %v1350_v58 }
 0x10b   : > { %v1878_v63 = vrot.slane %v1445_v33, 7  ;;  %v1877_v24 = vrot.slane %v1445_v33, 1  ;;  %v374_v4 = vadd.f32 %v366_v19, %v1353_v5  ;;  %v538_v2 = vmul.f32 0.015479996, %v258_v28 }
 0x10c   : > { %v464_v0 = vadd.f32 %v456_v23, %v1356_v3  ;;  %v1485_v58 = vadd.f32 %v535_v31, %v1342_v42  ;;  %v257_v5 = vadd.f32 %v244_v20, %v1312_v62  ;;  %v248_v3 = vpop.permute.xlu0 %247  ;;  %v320_v28 = vsel %vm313_vm4, %v1882_v39, %v304_v55  ;;  %v1911_v39 = vld [vmem:[#allocation11_spill] sm:$0xff] }
 0x10d   : > { %v492_v12 = vsel %vm485_vm2, %v1878_v63, %v1884_v18  ;;  %v1482_v40 = vsel %vm502_vm3, %v1877_v24, %v1883_v46  ;;  %v1495_v41 = vadd.f32 %v1235_v50, %v282_v47  ;;  %v1498_v19 = vadd.f32 %v1238_v51, %v374_v4 }
 0x10e   : > { %v1501_v23 = vadd.f32 %v250_v34, %v1334_v30  ;;  %v1504_v42 = vadd.f32 %v464_v0, %v1235_v50  ;;  %v273_v62 = vmul.f32 0.009412092, %v257_v5  ;;  %v365_v31 = vmul.f32 0.04625441, %v257_v5 }
 0x10f   : > { %v455_v20 = vmul.f32 0.03417562, %v257_v5  ;;  %v1512_v47 = vsel %vm330_vm5, %v1881_v59, %v323_v17  ;;  %v1516_v4 = vadd.f32 %v538_v2, %v1361_v48  ;;  %v259_v30 = vadd.f32 %v248_v3, %v1336_v38  ;;  %v1910_v2 = vld [vmem:[#allocation10_spill] sm:$0xff]  ;;  %v1912_v48 = vld [vmem:[#allocation12_spill] sm:$0xff] }
 0x110   : > { %v1889_v50 = vrot.slane %v1495_v41, 3  ;;  %v1888_v34 = vrot.slane %v1498_v19, 6  ;;  %v281_v0 = vadd.f32 %v273_v62, %v1358_v35  ;;  %v373_v24 = vadd.f32 %v365_v31, %v1364_v57 }
 0x111   : > { %v463_v9 = vadd.f32 %v455_v20, %v1367_v10  ;;  %v276_v52 = vmul.f32 0.009412092, %v1501_v23  ;;  %v368_v59 = vmul.f32 0.04625441, %v1501_v23  ;;  %v1887_v38 = vrot.slane %v1504_v42, 1 }
 0x112   : > { %v297_v3 = vadd.f32 %v1910_v2, %v281_v0  ;;  %v389_v51 = vadd.f32 %v1911_v39, %v373_v24  ;;  %v537_v62 = vmul.f32 0.015479996, %v257_v5  ;;  %v458_v0 = vmul.f32 0.03417562, %v1501_v23 }
 0x113   : > { %v471_v35 = vadd.f32 %v463_v9, %v1910_v2  ;;  %v284_v57 = vadd.f32 %v276_v52, %v1372_v11  ;;  %v376_v31 = vadd.f32 %v368_v59, %v1375_v13  ;;  %v1913_v52 = vld [vmem:[#allocation13_spill] sm:$0xff]  ;;  %v1915_v5 = vrot.slane %v1498_v19, 2 }
 0x114   : > { %v305_v10 = vrot.slane %v297_v3, 5  ;;  %v324_v20 = vrot.slane %v297_v3, 3  ;;  %v397_v46 = vrot.slane %v389_v51, 6  ;;  %v414_v18 = vrot.slane %v389_v51, 2 }
 0x115   : > { %v479_v15 = vrot.slane %v471_v35, 7  ;;  %v496_v63 = vrot.slane %v471_v35, 1  ;;  %v1535_v44 = vadd.f32 %v1912_v48, %v284_v57  ;;  %v1551_v39 = vadd.f32 %v1913_v52, %v376_v31 }
 0x116   : > { %v319_v9 = vsel %vm313_vm4, %v304_v55, %v305_v10  ;;  %v335_v11 = vsel %vm330_vm5, %v324_v20, %v1889_v50  ;;  %v336_v13 = vsel %vm330_vm5, %v323_v17, %v324_v20  ;;  %v1557_v59 = vsel %vm403_vm0, %v397_v46, %v1888_v34 }
 0x117   : > { %v1914_v55 = vrot.slane %v1417_v32, 6  ;;  %v425_v14 = vsel %vm420_vm1, %v414_v18, %v1915_v5  ;;  %v1916_v17 = vrot.slane %v1417_v32, 2  ;;  %v1917_v2 = vrot.slane %v1504_v42, 7 }
 0x118   : > { %v1918_v35 = vrot.slane %v1420_v29, 7  ;;  %v507_v57 = vsel %vm502_vm3, %v496_v63, %v1887_v38  ;;  %v1919_v32 = vrot.slane %v1420_v29, 1  ;;  %v552_v31 = vadd.f32 %v336_v13, %v320_v28  ;;  %v254_v38 = vpop.permute.xlu1 %253 }
 0x119   : > { %v409_v24 = vsel %vm403_vm0, %v1914_v55, %v397_v46  ;;  %v426_v51 = vsel %vm420_vm1, %v1916_v17, %v414_v18  ;;  %v1575_v3 = vsel %vm485_vm2, %v479_v15, %v1917_v2  ;;  %v553_v20 = vadd.f32 %v335_v11, %v319_v9 }
 0x11a   : > { %v491_v46 = vsel %vm485_vm2, %v1918_v35, %v479_v15  ;;  %v508_v18 = vsel %vm502_vm3, %v1919_v32, %v496_v63  ;;  %v560_v52 = vadd.f32 %v426_v51, %v1455_v26  ;;  %v561_v55 = vadd.f32 %v425_v14, %v409_v24 }
 0x11b   : > { %v1920_v5 = vrot.slane %v1495_v41, 5  ;;  %v545_v17 = vadd.f32 %v537_v62, %v1370_v8  ;;  %v568_v2 = vadd.f32 %v508_v18, %v492_v12  ;;  %v569_v35 = vadd.f32 %v507_v57, %v491_v46 }
 0x11c   : > { %v576_v34 = vadd.f32 %v560_v52, %v552_v31  ;;  %v577_v29 = vadd.f32 %v561_v55, %v553_v20  ;;  %v308_v50 = vrot.slane %v1535_v44, 5  ;;  %v327_v63 = vrot.slane %v1535_v44, 3  ;;  %v1922_v31 = vld [vmem:[#allocation15_spill] sm:$0xff] }
 0x11d   : > { %v318_v15 = vsel %vm313_vm4, %v305_v10, %v1920_v5  ;;  %v584_v28 = vadd.f32 %v568_v2, %v1436_v43  ;;  %v585_v26 = vadd.f32 %v569_v35, %v545_v17  ;;  %v400_v9 = vrot.slane %v1551_v39, 6 }
 0x11e   : > { %v466_v11 = vadd.f32 %v458_v0, %v1378_v56  ;;  %v275_v13 = vmul.f32 0.009412092, %v259_v30  ;;  %v367_v10 = vmul.f32 0.04625441, %v259_v30  ;;  %v457_v24 = vmul.f32 0.03417562, %v259_v30 }
 0x11f   : > { %v1601_v8 = vadd.f32 %v254_v38, %v1346_v61  ;;  %v592_v12 = vadd.f32 %v584_v28, %v576_v34  ;;  %v593_v62 = vadd.f32 %v585_v26, %v577_v29  ;;  %v539_v51 = vmul.f32 0.015479996, %v259_v30  ;;  %v1921_v38 = vld [vmem:[#allocation14_spill] sm:$0xff] }
 0x120   : > { %v1604_v14 = vadd.f32 %v466_v11, %v1912_v48  ;;  %v283_v46 = vadd.f32 %v275_v13, %v1383_v16  ;;  %v375_v43 = vadd.f32 %v367_v10, %v1390_v7  ;;  %v465_v57 = vadd.f32 %v457_v24, %v1393_v53 }
 0x121   : > { %v278_v56 = vmul.f32 0.009412092, %v1601_v8  ;;  %v792_v0 = vadd.f32 -0.15, %v592_v12  ;;  %v793_v32 = vadd.f32 -0.15, %v593_v62  ;;  %v547_v53 = vadd.f32 %v539_v51, %v1398_v22 }
 0x122   : > { %v417_v18 = vrot.slane %v1551_v39, 2  ;;  %v482_v61 = vrot.slane %v1604_v14, 7  ;;  %v499_v34 = vrot.slane %v1604_v14, 1  ;;  %v299_v48 = vadd.f32 %v1921_v38, %v283_v46 }
 0x123   : > { %v391_v30 = vadd.f32 %v1922_v31, %v375_v43  ;;  %v473_v16 = vadd.f32 %v465_v57, %v1921_v38  ;;  %v608_v20 = vmul.f32 %v792_v0, %v792_v0  ;;  %v609_v7 = vmul.f32 %v793_v32, %v793_v32 }
 0x124   : > { %v286_v52 = vadd.f32 %v278_v56, %v1385_v27  ;;  %v307_v55 = vrot.slane %v299_v48, 5  ;;  %v326_v5 = vrot.slane %v299_v48, 3  ;;  %v1923_v11 = vrot.slane %v1495_v41, 5 }
 0x125   : > { %v399_v17 = vrot.slane %v391_v30, 6  ;;  %v416_v2 = vrot.slane %v391_v30, 2  ;;  %v616_v35 = vmul.f32 -2222.2222, %v608_v20  ;;  %v617_v29 = vmul.f32 -2222.2222, %v609_v7 }
 0x126   : > { %v481_v28 = vrot.slane %v473_v16, 7  ;;  %v498_v26 = vrot.slane %v473_v16, 1  ;;  %v317_v13 = vsel %vm313_vm4, %v1923_v11, %v307_v55  ;;  %v333_v22 = vsel %vm330_vm5, %v326_v5, %v327_v63 }
 0x127   : > { %v1924_v27 = vrot.slane %v1495_v41, 3  ;;  %v370_v24 = vmul.f32 0.04625441, %v1601_v8  ;;  %v625_v12 = vmul.f32 1.442695, %v616_v35  ;;  %v1635_v51 = vsel %vm403_vm0, %v399_v17, %v400_v9 }
 0x128   : > { %v627_v62 = vmul.f32 1.442695, %v617_v29  ;;  %v1925_v46 = vrot.slane %v1498_v19, 6  ;;  %v423_v41 = vsel %vm420_vm1, %v416_v2, %v417_v18  ;;  %v1926_v57 = vrot.slane %v1498_v19, 2 }
 0x129   : > { %v334_v10 = vsel %vm330_vm5, %v1924_v27, %v326_v5  ;;  %v1653_v0 = vsel %vm485_vm2, %v481_v28, %v482_v61  ;;  %v1927_v32 = vrot.slane %v1504_v42, 7  ;;  %870 = vpow2.f32 %v625_v12 }
 0x12a   : > { %v407_v43 = vsel %vm403_vm0, %v1925_v46, %v399_v17  ;;  %v424_v56 = vsel %vm420_vm1, %v1926_v57, %v416_v2  ;;  %v505_v19 = vsel %vm502_vm3, %v498_v26, %v499_v34  ;;  %v1928_v48 = vrot.slane %v1504_v42, 1  ;;  %v1929_v2 = vld [vmem:[#allocation16_spill] sm:$0xff] }
 0x12b   : > { %v489_v38 = vsel %vm485_vm2, %v1927_v32, %v481_v28  ;;  %v554_v30 = vadd.f32 %v334_v10, %v318_v15  ;;  %872 = vpow2.f32 %v627_v62  ;;  %v555_v16 = vadd.f32 %v333_v22, %v317_v13  ;;  %v252_v28 = vpop.permute.xlu0 %251 }
 0x12c   : > { %v506_v31 = vsel %vm502_vm3, %v1928_v48, %v498_v26  ;;  %v562_v20 = vadd.f32 %v424_v56, %v1557_v59  ;;  %v563_v7 = vadd.f32 %v423_v41, %v407_v43  ;;  %v571_v17 = vadd.f32 %v505_v19, %v489_v38 }
 0x12d   : > { %v570_v5 = vadd.f32 %v506_v31, %v1575_v3  ;;  %v1670_v35 = vadd.f32 %v1929_v2, %v286_v52  ;;  %v378_v29 = vadd.f32 %v370_v24, %v1401_v21  ;;  %v1674_v42 = vmul.f32 0.015479996, %v1501_v23  ;;  %v1930_v52 = vld [vmem:[#allocation17_spill] sm:$0xff] }
 0x12e   : > { %v578_v11 = vadd.f32 %v562_v20, %v554_v30  ;;  %v579_v26 = vadd.f32 %v563_v7, %v555_v16  ;;  %v460_v15 = vmul.f32 0.03417562, %v1601_v8  ;;  %v587_v59 = vadd.f32 %v571_v17, %v547_v53 }
 0x12f   : > { %v586_v13 = vadd.f32 %v570_v5, %v1516_v4  ;;  %v310_v22 = vrot.slane %v1670_v35, 5  ;;  %v329_v3 = vrot.slane %v1670_v35, 3  ;;  %v1684_v21 = vsel %vm313_vm4, %v307_v55, %v308_v50 }
 0x130   : > { %v1687_v23 = vadd.f32 %v1930_v52, %v378_v29  ;;  %v468_v27 = vadd.f32 %v460_v15, %v1407_v36  ;;  %v261_v10 = vadd.f32 %v252_v28, %v1348_v1  ;;  %v595_v4 = vadd.f32 %v587_v59, %v579_v26  ;;  %v1937_v59 = vld [vmem:[#allocation18_spill] sm:$0xff] }
 0x131   : > { %v594_v24 = vadd.f32 %v586_v13, %v578_v11  ;;  %v1931_v53 = vrot.slane %v1427_v6, 5  ;;  %v1696_v62 = vmul.f32 0.015479996, %v1601_v8  ;;  %v1932_v55 = vrot.slane %v1427_v6, 3 }
 0x132   : > { %v402_v36 = vrot.slane %v1687_v23, 6  ;;  %v419_v1 = vrot.slane %v1687_v23, 2  ;;  %v1707_v43 = vadd.f32 %v468_v27, %v1929_v2  ;;  %v795_v57 = vadd.f32 -0.15, %v595_v4  ;;  %v1938_v23 = vld [vmem:[#allocation20_spill] sm:$0xff] }
 0x133   : > { %v321_v12 = vsel %vm313_vm4, %v310_v22, %v1931_v53  ;;  %v1702_v46 = vsel %vm330_vm5, %v329_v3, %v1932_v55  ;;  %v794_v41 = vadd.f32 -0.15, %v594_v24  ;;  %v277_v32 = vmul.f32 0.009412092, %v261_v10  ;;  %v871_v30 = vpop.eup %870 }
 0x134   : > { %v551_v56 = vadd.f32 %v1512_v47, %v321_v12  ;;  %v1933_v8 = vrot.slane %v1430_v37, 6  ;;  %v1934_v38 = vrot.slane %v1430_v37, 2  ;;  %v484_v48 = vrot.slane %v1707_v43, 7 }
 0x135   : > { %v501_v31 = vrot.slane %v1707_v43, 1  ;;  %v610_v16 = vmul.f32 %v794_v41, %v794_v41  ;;  %v611_v20 = vmul.f32 %v795_v57, %v795_v57  ;;  %v285_v7 = vadd.f32 %v277_v32, %v1410_v60  ;;  %v873_v5 = vpop.eup %872  ;;  %v1939_v57 = vld [vmem:[#allocation19_spill] sm:$0xff] }
 0x136   : > { %v411_v6 = vsel %vm403_vm0, %v402_v36, %v1933_v8  ;;  %v1718_v19 = vsel %vm420_vm1, %v419_v1, %v1934_v38  ;;  %v640_v17 = vmul.f32 2.0, %v871_v30  ;;  %v1935_v2 = vrot.slane %v1445_v33, 7  ;;  %v1940_v38 = vld [vmem:[#allocation9_spill] sm:$0xff] }
 0x137   : > { %v559_v47 = vadd.f32 %v1463_v45, %v411_v6  ;;  %v1936_v35 = vrot.slane %v1445_v33, 1  ;;  %v369_v45 = vmul.f32 0.04625441, %v261_v10  ;;  %v641_v28 = vmul.f32 2.0, %v873_v5 }
 0x138   : > { %v493_v37 = vsel %vm485_vm2, %v484_v48, %v1935_v2  ;;  %v618_v60 = vmul.f32 -2222.2222, %v610_v16  ;;  %v619_v11 = vmul.f32 -2222.2222, %v611_v20  ;;  %v800_v15 = vadd.f32 -1.0, %v640_v17  ;;  %v1941_v16 = vld [vmem:[#allocation8_spill] sm:$0xff] }
 0x139   : > { %v1736_v29 = vsel %vm502_vm3, %v501_v31, %v1936_v35  ;;  %v567_v26 = vadd.f32 %v1482_v40, %v493_v37  ;;  %v575_v13 = vadd.f32 %v559_v47, %v551_v56  ;;  %v301_v52 = vadd.f32 %v1937_v59, %v285_v7  ;;  %v1942_v37 = vld [vmem:[#allocation21_spill] sm:$0xff] }
 0x13a   : > { %v377_v27 = vadd.f32 %v369_v45, %v1938_v23  ;;  %v801_v24 = vadd.f32 -1.0, %v641_v28  ;;  %v629_v33 = vmul.f32 1.442695, %v618_v60  ;;  %v631_v4 = vmul.f32 1.442695, %v619_v11 }
 0x13b   : > { %v583_v53 = vadd.f32 %v567_v26, %v1485_v58  ;;  %v656_v12 = vmul.f32 0.1, %v800_v15  ;;  %v309_v55 = vrot.slane %v301_v52, 5  ;;  %v328_v41 = vrot.slane %v301_v52, 3 }
 0x13c   : > { %v393_v32 = vadd.f32 %v1939_v57, %v377_v27  ;;  %v657_v8 = vmul.f32 0.1, %v801_v24  ;;  %874 = vpow2.f32 %v629_v33  ;;  %v459_v40 = vmul.f32 0.03417562, %v261_v10  ;;  %v1943_v27 = vld [vmem:[#allocation22_spill] sm:$0xff] }
 0x13d   : > { %v591_v6 = vadd.f32 %v583_v53, %v575_v13  ;;  %v664_v56 = vadd.f32 %v656_v12, %v1940_v38  ;;  %876 = vpow2.f32 %v631_v4  ;;  %v314_v30 = vsel %vm313_vm4, %v309_v55, %v310_v22  ;;  %v886_v38 = vld [vmem:[%s1122_s30 + $0x18] sm:$0xff] }
 0x13e   : > { %v315_v58 = vsel %vm313_vm4, %v308_v50, %v309_v55  ;;  %v665_v20 = vadd.f32 %v657_v8, %v1941_v16  ;;  %v331_v7 = vsel %vm330_vm5, %v328_v41, %v329_v3  ;;  %v332_v5 = vsel %vm330_vm5, %v327_v63, %v328_v41 }
 0x13f   : > { %v791_v47 = vadd.f32 -0.15, %v591_v6  ;;  %v672_v17 = vmax.f32 %v664_v56, 0.0  ;;  %v401_v2 = vrot.slane %v393_v32, 6  ;;  %v418_v22 = vrot.slane %v393_v32, 2 }
 0x140   : > { %v467_v35 = vadd.f32 %v459_v40, %v1942_v37  ;;  %v673_v45 = vmax.f32 %v665_v20, 0.0  ;;  %v541_v50 = vmul.f32 0.015479996, %v261_v10  ;;  %v556_v60 = vadd.f32 %v332_v5, %v1684_v21 }
 0x141   : > { %v607_v28 = vmul.f32 %v791_v47, %v791_v47  ;;  %v680_v11 = vmin.f32 %v672_v17, 1.0  ;;  %v404_v3 = vsel %vm403_vm0, %v401_v2, %v402_v36  ;;  %v405_v44 = vsel %vm403_vm0, %v400_v9, %v401_v2 }
 0x142   : > { %v421_v63 = vsel %vm420_vm1, %v418_v22, %v419_v1  ;;  %v681_v26 = vmin.f32 %v673_v45, 1.0  ;;  %v422_v10 = vsel %vm420_vm1, %v417_v18, %v418_v22  ;;  %v475_v21 = vadd.f32 %v467_v35, %v1937_v59 }
 0x143   : > { %v615_v15 = vmul.f32 -2222.2222, %v607_v28  ;;  %688 = vst [vmem:[%s1774_s3 + $0x8] sm:$0xff] %v680_v11  ;;  %v548_v9 = vadd.f32 %v1674_v42, %v1381_v54  ;;  %v557_v36 = vadd.f32 %v331_v7, %v315_v58  ;;  %v558_v1 = vadd.f32 %v1702_v46, %v314_v30  ;;  %v887_v58 = vld [vmem:[%s1122_s30 + $0x20] sm:$0xff] }
 0x144   : > { %v564_v13 = vadd.f32 %v422_v10, %v1635_v51  ;;  %689 = vst [vmem:[%s1774_s3 + $0x10] sm:$0xff] %v681_v26  ;;  %v483_v52 = vrot.slane %v475_v21, 7  ;;  %v500_v18 = vrot.slane %v475_v21, 1  ;;  %v565_v23 = vadd.f32 %v421_v63, %v405_v44  ;;  %v888_v26 = vld [vmem:[%s1122_s30] sm:$0xff] }
 0x145   : > { %v623_v39 = vmul.f32 1.442695, %v615_v15  ;;  %v550_v59 = vadd.f32 %v1696_v62, %v1424_v25  ;;  %v549_v24 = vadd.f32 %v541_v50, %v1943_v27  ;;  %v566_v33 = vadd.f32 %v1718_v19, %v404_v3 }
 0x146   : > { %v580_v4 = vadd.f32 %v564_v13, %v556_v60  ;;  %v875_v53 = vpop.eup %874  ;;  %v486_v54 = vsel %vm485_vm2, %v483_v52, %v484_v48  ;;  %v487_v51 = vsel %vm485_vm2, %v482_v61, %v483_v52  ;;  %v503_v25 = vsel %vm502_vm3, %v500_v18, %v501_v31 }
 0x147   : > { %878 = vpow2.f32 %v623_v39  ;;  %v877_v42 = vpop.eup %876  ;;  %v642_v62 = vmul.f32 2.0, %v875_v53  ;;  %v504_v46 = vsel %vm502_vm3, %v499_v34, %v500_v18  ;;  %v573_v19 = vadd.f32 %v503_v25, %v487_v51  ;;  %v891_v25 = vld [vmem:[%s1122_s30 + $0x38] sm:$0xff] }
 0x148   : > { %v574_v48 = vadd.f32 %v1736_v29, %v486_v54  ;;  %v643_v12 = vmul.f32 2.0, %v877_v42  ;;  %v572_v55 = vadd.f32 %v504_v46, %v1653_v0  ;;  %v581_v61 = vadd.f32 %v565_v23, %v557_v36  ;;  %v890_v54 = vld [vmem:[%s1122_s30 + $0x28] sm:$0xff] }
 0x149   : > { %v582_v43 = vadd.f32 %v566_v33, %v558_v1  ;;  %v802_v41 = vadd.f32 -1.0, %v642_v62  ;;  %v589_v57 = vadd.f32 %v573_v19, %v549_v24 }
 0x14a   : > { %v590_v31 = vadd.f32 %v574_v48, %v550_v59  ;;  %v803_v32 = vadd.f32 -1.0, %v643_v12  ;;  %v588_v8 = vadd.f32 %v572_v55, %v548_v9 }
 0x14b   : > { %v658_v6 = vmul.f32 0.1, %v802_v41  ;;  %v597_v14 = vadd.f32 %v589_v57, %v581_v61 }
 0x14c   : > { %v598_v40 = vadd.f32 %v590_v31, %v582_v43  ;;  %v659_v49 = vmul.f32 0.1, %v803_v32  ;;  %v596_v34 = vadd.f32 %v588_v8, %v580_v4  ;;  %v889_v4 = vld [vmem:[%s1122_s30 + $0x30] sm:$0xff] }
 0x14d   : > { %v666_v56 = vadd.f32 %v886_v38, %v658_v6  ;;  %v797_v30 = vadd.f32 -0.15, %v597_v14 }
 0x14e   : > { %v798_v29 = vadd.f32 -0.15, %v598_v40  ;;  %v667_v0 = vadd.f32 %v887_v58, %v659_v49  ;;  %v796_v16 = vadd.f32 -0.15, %v596_v34 }
 0x14f   : > { %v674_v20 = vmax.f32 %v666_v56, 0.0  ;;  %v613_v47 = vmul.f32 %v797_v30, %v797_v30 }
 0x150   : > { %v614_v7 = vmul.f32 %v798_v29, %v798_v29  ;;  %v675_v17 = vmax.f32 %v667_v0, 0.0  ;;  %v612_v2 = vmul.f32 %v796_v16, %v796_v16 }
 0x151   : > { %v879_v5 = vpop.eup %878  ;;  %v682_v22 = vmin.f32 %v674_v20, 1.0  ;;  %v621_v35 = vmul.f32 -2222.2222, %v613_v47 }
 0x152   : > { %v639_v37 = vmul.f32 2.0, %v879_v5  ;;  %v622_v45 = vmul.f32 -2222.2222, %v614_v7  ;;  %v683_v28 = vmin.f32 %v675_v17, 1.0  ;;  %v620_v50 = vmul.f32 -2222.2222, %v612_v2 }
 0x153   : > { %690 = vst [vmem:[%s1774_s3 + $0x18] sm:$0xff] %v682_v22  ;;  %v635_v11 = vmul.f32 1.442695, %v621_v35 }
 0x154   : > { %v799_v60 = vadd.f32 -1.0, %v639_v37  ;;  %v637_v3 = vmul.f32 1.442695, %v622_v45  ;;  %691 = vst [vmem:[%s1774_s3 + $0x20] sm:$0xff] %v683_v28  ;;  %v633_v44 = vmul.f32 1.442695, %v620_v50 }
 0x155   : > { %880 = vpow2.f32 %v635_v11 }
 0x156   : > { %v655_v63 = vmul.f32 0.1, %v799_v60  ;;  %882 = vpow2.f32 %v633_v44 }
 0x157   : > { %884 = vpow2.f32 %v637_v3 }
 0x158   : > { %v663_v15 = vadd.f32 %v888_v26, %v655_v63 }
 0x15a   : > { %v671_v10 = vmax.f32 %v663_v15, 0.0 }
 0x15c   : > { %v679_v21 = vmin.f32 %v671_v10, 1.0 }
 0x15e   : > { %687 = vst [vmem:[%s1774_s3] sm:$0xff] %v679_v21 }
 0x15f   : > { %v881_v9 = vpop.eup %880 }
 0x160   : > { %v883_v36 = vpop.eup %882  ;;  %v645_v1 = vmul.f32 2.0, %v881_v9 }
 0x161   : > { %v885_v13 = vpop.eup %884  ;;  %v644_v39 = vmul.f32 2.0, %v883_v36 }
 0x162   : > { %v646_v52 = vmul.f32 2.0, %v885_v13  ;;  %v805_v18 = vadd.f32 -1.0, %v645_v1 }
 0x163   : > { %v804_v23 = vadd.f32 -1.0, %v644_v39 }
 0x164   : > { %v806_v59 = vadd.f32 -1.0, %v646_v52  ;;  %v661_v27 = vmul.f32 0.1, %v805_v18 }
 0x165   : > { %v660_v24 = vmul.f32 0.1, %v804_v23 }
 0x166   : > { %v662_v33 = vmul.f32 0.1, %v806_v59  ;;  %v669_v53 = vadd.f32 %v889_v4, %v661_v27 }
 0x167   : > { %v668_v51 = vadd.f32 %v890_v54, %v660_v24 }
 0x168   : > { %v670_v42 = vadd.f32 %v891_v25, %v662_v33  ;;  %v677_v62 = vmax.f32 %v669_v53, 0.0 }
 0x169   : > { %v676_v46 = vmax.f32 %v668_v51, 0.0 }
 0x16a   : > { %v678_v19 = vmax.f32 %v670_v42, 0.0  ;;  %v685_v48 = vmin.f32 %v677_v62, 1.0 }
 0x16b   : > { %v684_v12 = vmin.f32 %v676_v46, 1.0 }
 0x16c   : > { %v686_v55 = vmin.f32 %v678_v19, 1.0  ;;  %693 = vst [vmem:[%s1774_s3 + $0x30] sm:$0xff] %v685_v48 }
 0x16d   : > { %692 = vst [vmem:[%s1774_s3 + $0x28] sm:$0xff] %v684_v12 }
 0x16e   : > { %694 = vst [vmem:[%s1774_s3 + $0x38] sm:$0xff] %v686_v55 }
 0x16f   : > { %935 = shalt.err (!%p932_p2)
}
 0x170   : > { %s936_s24 = scalar_lea.hbm %s1818_s14, 1024  ;;  %s940_s25 = scalar_lea.hbm %s1868_s1, 2048 }
 0x171   : > { %p937_p4 = scmp.ne.s32.totalorder %s1818_s14, %s936_s24  ;;  %p941_p9 = scmp.lt.u32.totalorder %s1818_s14, %s1868_s1 }
 0x172   : > { %p942_p1 = scmp.lt.u32.totalorder %s940_s25, %s936_s24  ;;  %p944_p6 = scmp.lt.u32.totalorder %s936_s24, %s1818_s14 }
 0x173   : > { %p938_p5 = pnand %p937_p4, %p1944_p11 }
 0x174   : > { %p943_p3 = por %p942_p1, %p941_p9 }
 0x175   : > { %p939_p7 = pneg %p938_p5 }
 0x176   : > { %p945_p12 = por %p944_p6, %p943_p3 }
 0x178   : > { %p946_p13 = pnand %p945_p12, %p939_p7 }
 0x17a   : > { %949 = shalt.err (!%p946_p13)
}
 0x17b   : > { %s1000_s28 = smov 128   ;;  %s1001_s29 = smov 8  }
 0x17c   : > { %816 = dma.vmem_to_hbm [thread:$0]  (%p1944_p11), %s1820_s5, 1024, %s1818_s14, %s696_s10, %s1000_s28, %s1000_s28, %s1001_s29  }
 0x17d PF: > { %s724_s2 = sand.u32 1, %s976_s6   ;;  %p1945_p8 = scmp.ne.s32.totalorder %s1893_s19, 0 }
 0x17e   : > { %p1946_p10 = scmp.ge.s32.totalorder %s988_s9, 2  ;;  %s725_s3 = scalar_lea.sflag [#allocation4], %s724_s2 }
 0x180   : > { %p823_p0 = pnand %p1946_p10, %p1945_p8 }
 0x182   : > { %971 = dma.done.wait (!%p823_p0), %s725_s3, 1024  }
 0x183   : > { %973 = vsyncadd (!%p823_p0), %s725_s3, 4294966272  ;;  %p14_p2 = scmp.ge.s32.totalorder %s1037_s12, 4   ;;  %s1947_s6 = smov %s980_s7 }
 0x184   : > { %s1948_s7 = smov %s984_s8  ;;  %s1949_s8 = smov %s1049_s15 }
 0x185   : > { %s1950_s9 = smov %s1037_s12  ;;  %16 = sbr.rel (!%p14_p2) target bundleno = 5 (0x5), region = 69 }
 0x18c   :  { %730 = vsyncpa [#allocation3], 1 }
 0x18d   :  { %732 = vsyncpa [#allocation3 + $0x1], 1 }
 0x18e   :  { %733 = vsyncpa [#allocation4], 1 }
 0x18f   :  { %735 = vsyncpa [#allocation4 + $0x1], 1 }

</bundles_post_ra>
